<compile_context>
chip_gen: v5e
topology: v5e:2x2
jax: 0.10.0
libtpu: 0.0.40
codegen_flags: <defaults>
</compile_context>

<pallas_src>
import functools

import jax
import jax.numpy as jnp
from jax.experimental import pallas as pl
from jax.experimental.pallas import tpu as pltpu


def _mha_kernel(x_ref, wqkv_ref, wp_ref, bp_ref, out_ref, *,
                num_heads, head_size, seq_len, batch_block, approx_recip):
    """Fused multi-head causal self-attention + output projection.

    x_ref    : (Bb, T, C)   input activations (f32)
    wqkv_ref : (C, 3C)      fused [Wq*scale | Wk | Wv], head-major columns
    wp_ref   : (C, C)       output projection weight (already transposed)
    bp_ref   : (1, C)       output projection bias (f32)
    out_ref  : (Bb, T, C)   result
    """
    H, hs, T, Bb = num_heads, head_size, seq_len, batch_block
    C = H * hs
    n = Bb * T
    cd = wqkv_ref.dtype                       # MXU operand dtype (bf16 or f32)

    # --- fused QKV projection: ONE (Bb*T, C) @ (C, 3C) MXU matmul ----------
    xf = x_ref[...].reshape(n, C).astype(cd)
    qkv = jnp.dot(xf, wqkv_ref[...], preferred_element_type=jnp.float32)  # (n, 3C) f32

    # --- move heads from lanes into a single batch dim: (H*Bb, T, hs) ------
    # Expressed as H lane-slices + stack (ops that lower cleanly in Mosaic);
    # this is ONE relayout per tensor, after which every matmul is head-batched.
    def split_heads(z2d):                     # (n, C) head-major -> (H*Bb, T, hs)
        zh = jnp.stack([z2d[:, h * hs:(h + 1) * hs] for h in range(H)], axis=0)
        return zh.reshape(H * Bb, T, hs)      # batch index g = h*Bb + b

    qh = split_heads(qkv[:, 0 * C:1 * C])     # 1/sqrt(hs) pre-folded into Wq
    kh = split_heads(qkv[:, 1 * C:2 * C])
    vh = split_heads(qkv[:, 2 * C:3 * C])

    # --- head-batched attention: single batched dot_generals ---------------
    s = jnp.einsum('gqd,gkd->gqk', qh.astype(cd), kh.astype(cd),
                   preferred_element_type=jnp.float32)                 # (G, T, T) f32

    row = jax.lax.broadcasted_iota(jnp.int32, (T, T), 0)
    col = jax.lax.broadcasted_iota(jnp.int32, (T, T), 1)
    causal = (col <= row)[None]               # diagonal always unmasked -> no NaN rows
    s = jnp.where(causal, s, jnp.float32(float('-inf')))

    # Numerically stable softmax, normalization deferred past the PV matmul.
    m = jnp.max(s, axis=-1, keepdims=True)
    p = jnp.exp(s - m)                        # unnormalized probs (f32)
    denom = jnp.sum(p, axis=-1, keepdims=True)

    o = jnp.einsum('gqk,gkd->gqd', p.astype(cd), vh.astype(cd),
                   preferred_element_type=jnp.float32)                 # (G, T, hs) f32
    if approx_recip:
        o = o * pl.reciprocal(denom, approx=True)   # EUP slot, ~free
    else:
        o = o / denom                                # exact path (f32 semantics check)

    # --- heads back into lanes (torch.cat head order) + ONE output proj ----
    o4 = o.reshape(H, Bb, T, hs)
    cat = jnp.concatenate([o4[h] for h in range(H)], axis=-1)          # (Bb, T, C)
    y = jnp.dot(cat.reshape(n, C).astype(cd), wp_ref[...],
                preferred_element_type=jnp.float32) + bp_ref[...]      # (n, C) f32
    out_ref[...] = y.reshape(Bb, T, C).astype(out_ref.dtype)


def multi_head_attention(x, wq, wk, wv, wp_t, bp, *, num_heads, head_size,
                         compute_dtype=jnp.bfloat16, batch_block=None):
    """x: (B,T,C); wq/wk/wv: (H,C,hs) (pre-transposed); wp_t: (C,C); bp: (C,).

    batch_block=None -> grid=(1,) (whole batch in one block; best on 1-TC
    v5e/v6e).  Set batch_block=B//2 on v7x to give both TensorCores work.
    """
    B, T, C = x.shape
    H, hs = num_heads, head_size
    assert H * hs == C, "n_embd must equal num_heads * head_size"
    Bb = B if batch_block is None else batch_block
    assert B % Bb == 0

    # ---- host-side weight prep ----
    scale = jnp.float32(hs) ** -0.5

    def fuse(w):  # (H, C, hs) -> (C, H*hs), head-major columns (torch.cat order)
        return jnp.transpose(w, (1, 0, 2)).reshape(C, H * hs)

    wqkv = jnp.concatenate([fuse(wq) * scale, fuse(wk), fuse(wv)], axis=1)
    wqkv = wqkv.astype(compute_dtype)                 # (C, 3C): one DMA, one matmul
    wp = wp_t.astype(compute_dtype)                   # (C, C); no lane padding
    bp2 = bp.reshape(1, C).astype(jnp.float32)

    approx = (jnp.dtype(compute_dtype) != jnp.dtype(jnp.float32))
    kernel = functools.partial(
        _mha_kernel, num_heads=H, head_size=hs, seq_len=T,
        batch_block=Bb, approx_recip=approx)

    # Advisory cost estimate for the XLA scheduler.
    flops = int(2 * B * T * C * (3 * C)           # fused QKV projection
                + 4 * B * H * T * T * hs          # QK^T and P@V
                + 2 * B * T * C * C)              # output projection
    transcendentals = int(B * H * T * T + B * H * T)   # exp + reciprocal
    w_itemsize = jnp.dtype(compute_dtype).itemsize
    bytes_accessed = int(x.size * x.dtype.itemsize
                         + (wqkv.size + wp.size) * w_itemsize
                         + bp2.size * 4
                         + B * T * C * x.dtype.itemsize)

    out = pl.pallas_call(
        kernel,
        out_shape=jax.ShapeDtypeStruct((B, T, C), x.dtype),
        grid_spec=pltpu.PrefetchScalarGridSpec(
            num_scalar_prefetch=0,
            grid=(B // Bb,),                      # default (1,): no grid overhead
            in_specs=[
                pl.BlockSpec((Bb, T, C), lambda i: (i, 0, 0)),   # x
                pl.BlockSpec((C, 3 * C), lambda i: (0, 0)),      # fused Wqkv
                pl.BlockSpec((C, C), lambda i: (0, 0)),          # Wproj^T
                pl.BlockSpec((1, C), lambda i: (0, 0)),          # bias
            ],
            out_specs=pl.BlockSpec((Bb, T, C), lambda i: (i, 0, 0)),
        ),
        compiler_params=pltpu.CompilerParams(
            dimension_semantics=("parallel",)),
        cost_estimate=pl.CostEstimate(
            flops=flops, transcendentals=transcendentals,
            bytes_accessed=bytes_accessed),
    )(x, wqkv, wp, bp2)
    return out


def reference_mha(x, wq, wk, wv, wp_t, bp, *, num_heads, head_size):
    """Plain-JAX f32 reference mirroring the PyTorch module (eval mode)."""
    B, T, C = x.shape
    outs = []
    mask = jnp.tril(jnp.ones((T, T), dtype=bool))
    for h in range(num_heads):
        q = x @ wq[h]
        k = x @ wk[h]
        v = x @ wv[h]
        wei = (q @ jnp.swapaxes(k, -2, -1)) * (head_size ** -0.5)
        wei = jnp.where(mask[None], wei, -jnp.inf)
        wei = jax.nn.softmax(wei, axis=-1)
        outs.append(wei @ v)
    cat = jnp.concatenate(outs, axis=-1)
    return cat @ wp_t + bp


if __name__ == "__main__":
    # Small shapes consistent with the module.
    B, T = 2, 8
    n_embd, num_heads = 32, 4
    head_size = n_embd // num_heads

    key = jax.random.PRNGKey(0)
    kx, kq, kk, kv, kp, kb = jax.random.split(key, 6)

    x = jax.random.normal(kx, (B, T, n_embd), dtype=jnp.float32)

    # Per-head Linear(n_embd -> head_size, bias=False) weights, stored transposed
    # as (H, n_embd, head_size) so the math is x @ W (same as torch Linear^T).
    scale = 1.0 / jnp.sqrt(n_embd)
    wq = jax.random.normal(kq, (num_heads, n_embd, head_size), jnp.float32) * scale
    wk = jax.random.normal(kk, (num_heads, n_embd, head_size), jnp.float32) * scale
    wv = jax.random.normal(kv, (num_heads, n_embd, head_size), jnp.float32) * scale
    # Output projection Linear(n_embd -> n_embd) with bias, stored transposed (C, C).
    wp_t = jax.random.normal(kp, (n_embd, n_embd), jnp.float32) * scale
    bp = jax.random.normal(kb, (n_embd,), jnp.float32) * 0.1

    ref = reference_mha(x, wq, wk, wv, wp_t, bp,
                        num_heads=num_heads, head_size=head_size)

    # 1) Same-semantics check: f32 MXU operands, exact softmax divide.
    out_f32 = jax.block_until_ready(multi_head_attention(
        x, wq, wk, wv, wp_t, bp, num_heads=num_heads, head_size=head_size,
        compute_dtype=jnp.float32))
    assert out_f32.shape == (B, T, n_embd)
    assert jnp.allclose(out_f32, ref, atol=2e-2, rtol=2e-2), "fp32 kernel mismatch"

    # 2) Fast path: bf16 MXU operands, f32 accumulation/softmax, approx recip.
    out_bf16 = jax.block_until_ready(multi_head_attention(
        x, wq, wk, wv, wp_t, bp, num_heads=num_heads, head_size=head_size,
        compute_dtype=jnp.bfloat16))
    assert out_bf16.shape == (B, T, n_embd)
    rel_err = jnp.linalg.norm(out_bf16 - ref) / jnp.linalg.norm(ref)
    assert rel_err < 0.05, f"bf16 kernel relative error too large: {rel_err}"

    # 3) v7x-style config: 2-way parallel grid over the batch (both TensorCores).
    out_split = jax.block_until_ready(multi_head_attention(
        x, wq, wk, wv, wp_t, bp, num_heads=num_heads, head_size=head_size,
        compute_dtype=jnp.bfloat16, batch_block=1))
    rel_err2 = jnp.linalg.norm(out_split - ref) / jnp.linalg.norm(ref)
    assert rel_err2 < 0.05, f"batched-grid kernel relative error too large: {rel_err2}"

    print("KERNEL_OK")
</pallas_src>

<mosaic_0001>
module attributes {stable_mosaic.version = 11 : i64} {
  func.func @_mha_kernel(%arg0: i32, %arg1: memref<2x8x32xf32, #tpu.memory_space<vmem>>, %arg2: memref<32x96xf32, #tpu.memory_space<vmem>>, %arg3: memref<32x32xf32, #tpu.memory_space<vmem>>, %arg4: memref<1x32xf32, #tpu.memory_space<vmem>>, %arg5: memref<2x8x32xf32, #tpu.memory_space<vmem>>) attributes {dimension_semantics = [#tpu.dimension_semantics<parallel>], iteration_bounds = array<i64: 1>, scalar_prefetch = 0 : i64, scratch_operands = 0 : i64, tpu.core_type = #tpu.core_type<tc>, window_params = [{transform_indices = @transform_0, window_bounds = array<i64: 2, 8, 32>}, {pipeline_mode = #tpu.pipeline_mode<synchronous>, transform_indices = @transform_1, window_bounds = array<i64: 32, 96>}, {pipeline_mode = #tpu.pipeline_mode<synchronous>, transform_indices = @transform_2, window_bounds = array<i64: 32, 32>}, {pipeline_mode = #tpu.pipeline_mode<synchronous>, transform_indices = @transform_3, window_bounds = array<i64: 1, 32>}, {transform_indices = @transform_4, window_bounds = array<i64: 2, 8, 32>}]} {
    %c0 = arith.constant 0 : index
    %c0_0 = arith.constant 0 : index
    %c0_1 = arith.constant 0 : index
    %0 = vector.load %arg1[%c0, %c0_0, %c0_1] : memref<2x8x32xf32, #tpu.memory_space<vmem>>, vector<2x8x32xf32>
    %1 = vector.shape_cast %0 : vector<2x8x32xf32> to vector<16x32xf32>
    %c0_2 = arith.constant 0 : index
    %c0_3 = arith.constant 0 : index
    %2 = vector.load %arg2[%c0_2, %c0_3] : memref<32x96xf32, #tpu.memory_space<vmem>>, vector<32x96xf32>
    %cst = arith.constant dense<0.000000e+00> : vector<16x96xf32>
    %3 = tpu.matmul %1, %2, %cst {dimension_numbers = #tpu.dot_dimension_numbers<[1], [0], [0], [1], [0, 0, 1, 1], [], []>} : vector<16x32xf32>, vector<32x96xf32>, vector<16x96xf32> -> vector<16x96xf32>
    %4 = vector.extract_strided_slice %3 {offsets = [0, 0], sizes = [16, 32], strides = [1, 1]} : vector<16x96xf32> to vector<16x32xf32>
    %5 = vector.extract_strided_slice %4 {offsets = [0, 0], sizes = [16, 8], strides = [1, 1]} : vector<16x32xf32> to vector<16x8xf32>
    %6 = vector.extract_strided_slice %4 {offsets = [0, 8], sizes = [16, 8], strides = [1, 1]} : vector<16x32xf32> to vector<16x8xf32>
    %7 = vector.extract_strided_slice %4 {offsets = [0, 16], sizes = [16, 8], strides = [1, 1]} : vector<16x32xf32> to vector<16x8xf32>
    %8 = vector.extract_strided_slice %4 {offsets = [0, 24], sizes = [16, 8], strides = [1, 1]} : vector<16x32xf32> to vector<16x8xf32>
    %9 = vector.shape_cast %5 : vector<16x8xf32> to vector<1x16x8xf32>
    %10 = vector.shape_cast %6 : vector<16x8xf32> to vector<1x16x8xf32>
    %11 = vector.shape_cast %7 : vector<16x8xf32> to vector<1x16x8xf32>
    %12 = vector.shape_cast %8 : vector<16x8xf32> to vector<1x16x8xf32>
    %13 = tpu.concatenate %9, %10, %11, %12 in 0 : vector<1x16x8xf32>, vector<1x16x8xf32>, vector<1x16x8xf32>, vector<1x16x8xf32> -> vector<4x16x8xf32>
    %14 = vector.shape_cast %13 : vector<4x16x8xf32> to vector<8x8x8xf32>
    %15 = vector.extract_strided_slice %3 {offsets = [0, 32], sizes = [16, 32], strides = [1, 1]} : vector<16x96xf32> to vector<16x32xf32>
    %16 = vector.extract_strided_slice %15 {offsets = [0, 0], sizes = [16, 8], strides = [1, 1]} : vector<16x32xf32> to vector<16x8xf32>
    %17 = vector.extract_strided_slice %15 {offsets = [0, 8], sizes = [16, 8], strides = [1, 1]} : vector<16x32xf32> to vector<16x8xf32>
    %18 = vector.extract_strided_slice %15 {offsets = [0, 16], sizes = [16, 8], strides = [1, 1]} : vector<16x32xf32> to vector<16x8xf32>
    %19 = vector.extract_strided_slice %15 {offsets = [0, 24], sizes = [16, 8], strides = [1, 1]} : vector<16x32xf32> to vector<16x8xf32>
    %20 = vector.shape_cast %16 : vector<16x8xf32> to vector<1x16x8xf32>
    %21 = vector.shape_cast %17 : vector<16x8xf32> to vector<1x16x8xf32>
    %22 = vector.shape_cast %18 : vector<16x8xf32> to vector<1x16x8xf32>
    %23 = vector.shape_cast %19 : vector<16x8xf32> to vector<1x16x8xf32>
    %24 = tpu.concatenate %20, %21, %22, %23 in 0 : vector<1x16x8xf32>, vector<1x16x8xf32>, vector<1x16x8xf32>, vector<1x16x8xf32> -> vector<4x16x8xf32>
    %25 = vector.shape_cast %24 : vector<4x16x8xf32> to vector<8x8x8xf32>
    %26 = vector.extract_strided_slice %3 {offsets = [0, 64], sizes = [16, 32], strides = [1, 1]} : vector<16x96xf32> to vector<16x32xf32>
    %27 = vector.extract_strided_slice %26 {offsets = [0, 0], sizes = [16, 8], strides = [1, 1]} : vector<16x32xf32> to vector<16x8xf32>
    %28 = vector.extract_strided_slice %26 {offsets = [0, 8], sizes = [16, 8], strides = [1, 1]} : vector<16x32xf32> to vector<16x8xf32>
    %29 = vector.extract_strided_slice %26 {offsets = [0, 16], sizes = [16, 8], strides = [1, 1]} : vector<16x32xf32> to vector<16x8xf32>
    %30 = vector.extract_strided_slice %26 {offsets = [0, 24], sizes = [16, 8], strides = [1, 1]} : vector<16x32xf32> to vector<16x8xf32>
    %31 = vector.shape_cast %27 : vector<16x8xf32> to vector<1x16x8xf32>
    %32 = vector.shape_cast %28 : vector<16x8xf32> to vector<1x16x8xf32>
    %33 = vector.shape_cast %29 : vector<16x8xf32> to vector<1x16x8xf32>
    %34 = vector.shape_cast %30 : vector<16x8xf32> to vector<1x16x8xf32>
    %35 = tpu.concatenate %31, %32, %33, %34 in 0 : vector<1x16x8xf32>, vector<1x16x8xf32>, vector<1x16x8xf32>, vector<1x16x8xf32> -> vector<4x16x8xf32>
    %36 = vector.shape_cast %35 : vector<4x16x8xf32> to vector<8x8x8xf32>
    "tpu.trace_start"() <{level = 10 : i32, message = "gqd,gkd->gqk"}> : () -> ()
    %cst_4 = arith.constant dense<0.000000e+00> : vector<8x8x8xf32>
    %37 = tpu.matmul %14, %25, %cst_4 {dimension_numbers = #tpu.dot_dimension_numbers<[2], [2], [1], [1], [0, 0, 0, 1, 1, 1], [0], [0]>} : vector<8x8x8xf32>, vector<8x8x8xf32>, vector<8x8x8xf32> -> vector<8x8x8xf32>
    "tpu.trace_stop"() : () -> ()
    %38 = tpu.iota {dimensions = array<i32: 0>} : vector<8x8xi32>
    %39 = tpu.iota {dimensions = array<i32: 1>} : vector<8x8xi32>
    %40 = arith.cmpi sle, %39, %38 : vector<8x8xi32>
    %41 = vector.shape_cast %40 : vector<8x8xi1> to vector<1x8x8xi1>
    %cst_5 = arith.constant 0xFF800000 : f32
    %42 = vector.shape_cast %41 : vector<1x8x8xi1> to vector<1x8x8xi1>
    %43 = vector.broadcast %42 : vector<1x8x8xi1> to vector<8x8x8xi1>
    %44 = vector.broadcast %cst_5 : f32 to vector<8x8x8xf32>
    %45 = arith.select %43, %37, %44 : vector<8x8x8xi1>, vector<8x8x8xf32>
    %cst_6 = arith.constant dense<0xFF800000> : vector<8x8xf32>
    %46 = vector.multi_reduction <maximumf>, %45, %cst_6 [2] : vector<8x8x8xf32> to vector<8x8xf32>
    %47 = vector.shape_cast %46 : vector<8x8xf32> to vector<8x8x1xf32>
    %48 = vector.broadcast %47 : vector<8x8x1xf32> to vector<8x8x8xf32>
    %49 = arith.subf %45, %48 : vector<8x8x8xf32>
    %50 = math.exp %49 : vector<8x8x8xf32>
    %cst_7 = arith.constant dense<0.000000e+00> : vector<8x8xf32>
    %51 = vector.multi_reduction <add>, %50, %cst_7 [2] : vector<8x8x8xf32> to vector<8x8xf32>
    %52 = vector.shape_cast %51 : vector<8x8xf32> to vector<8x8x1xf32>
    "tpu.trace_start"() <{level = 10 : i32, message = "gqk,gkd->gqd"}> : () -> ()
    %cst_8 = arith.constant dense<0.000000e+00> : vector<8x8x8xf32>
    %53 = tpu.matmul %50, %36, %cst_8 {dimension_numbers = #tpu.dot_dimension_numbers<[2], [1], [1], [2], [0, 0, 0, 1, 1, 2], [0], [0]>} : vector<8x8x8xf32>, vector<8x8x8xf32>, vector<8x8x8xf32> -> vector<8x8x8xf32>
    "tpu.trace_stop"() : () -> ()
    %54 = vector.broadcast %52 : vector<8x8x1xf32> to vector<8x8x8xf32>
    %55 = arith.divf %53, %54 : vector<8x8x8xf32>
    %56 = vector.shape_cast %55 : vector<8x8x8xf32> to vector<4x2x8x8xf32>
    %57 = vector.extract_strided_slice %56 {offsets = [0, 0, 0, 0], sizes = [1, 2, 8, 8], strides = [1, 1, 1, 1]} : vector<4x2x8x8xf32> to vector<1x2x8x8xf32>
    %58 = vector.shape_cast %57 : vector<1x2x8x8xf32> to vector<2x8x8xf32>
    %59 = vector.extract_strided_slice %56 {offsets = [1, 0, 0, 0], sizes = [1, 2, 8, 8], strides = [1, 1, 1, 1]} : vector<4x2x8x8xf32> to vector<1x2x8x8xf32>
    %60 = vector.shape_cast %59 : vector<1x2x8x8xf32> to vector<2x8x8xf32>
    %61 = vector.extract_strided_slice %56 {offsets = [2, 0, 0, 0], sizes = [1, 2, 8, 8], strides = [1, 1, 1, 1]} : vector<4x2x8x8xf32> to vector<1x2x8x8xf32>
    %62 = vector.shape_cast %61 : vector<1x2x8x8xf32> to vector<2x8x8xf32>
    %63 = vector.extract_strided_slice %56 {offsets = [3, 0, 0, 0], sizes = [1, 2, 8, 8], strides = [1, 1, 1, 1]} : vector<4x2x8x8xf32> to vector<1x2x8x8xf32>
    %64 = vector.shape_cast %63 : vector<1x2x8x8xf32> to vector<2x8x8xf32>
    %65 = tpu.concatenate %58, %60, %62, %64 in 2 : vector<2x8x8xf32>, vector<2x8x8xf32>, vector<2x8x8xf32>, vector<2x8x8xf32> -> vector<2x8x32xf32>
    %66 = vector.shape_cast %65 : vector<2x8x32xf32> to vector<16x32xf32>
    %c0_9 = arith.constant 0 : index
    %c0_10 = arith.constant 0 : index
    %67 = vector.load %arg3[%c0_9, %c0_10] : memref<32x32xf32, #tpu.memory_space<vmem>>, vector<32x32xf32>
    %cst_11 = arith.constant dense<0.000000e+00> : vector<16x32xf32>
    %68 = tpu.matmul %66, %67, %cst_11 {dimension_numbers = #tpu.dot_dimension_numbers<[1], [0], [0], [1], [0, 0, 1, 1], [], []>} : vector<16x32xf32>, vector<32x32xf32>, vector<16x32xf32> -> vector<16x32xf32>
    %c0_12 = arith.constant 0 : index
    %c0_13 = arith.constant 0 : index
    %69 = vector.load %arg4[%c0_12, %c0_13] : memref<1x32xf32, #tpu.memory_space<vmem>>, vector<1x32xf32>
    %70 = vector.broadcast %69 : vector<1x32xf32> to vector<16x32xf32>
    %71 = arith.addf %68, %70 : vector<16x32xf32>
    %72 = vector.shape_cast %71 : vector<16x32xf32> to vector<2x8x32xf32>
    %c0_14 = arith.constant 0 : index
    %c0_15 = arith.constant 0 : index
    %c0_16 = arith.constant 0 : index
    %73 = vector.load %arg5[%c0_14, %c0_15, %c0_16] : memref<2x8x32xf32, #tpu.memory_space<vmem>>, vector<2x8x32xf32>
    tpu.vector_store %arg5[%c0_14, %c0_15, %c0_16], %72 {strides = array<i32>} : memref<2x8x32xf32, #tpu.memory_space<vmem>>, vector<2x8x32xf32>,
    return
  }
  func.func @transform_0(%arg0: i32) -> (i32, i32, i32) {
    %c0_i32 = arith.constant 0 : i32
    %c0_i32_0 = arith.constant 0 : i32
    %c0_i32_1 = arith.constant 0 : i32
    return %arg0, %c0_i32, %c0_i32_0 : i32, i32, i32
  }
  func.func @transform_1(%arg0: i32) -> (i32, i32) {
    %c0_i32 = arith.constant 0 : i32
    %c0_i32_0 = arith.constant 0 : i32
    %c0_i32_1 = arith.constant 0 : i32
    return %c0_i32, %c0_i32_0 : i32, i32
  }
  func.func @transform_2(%arg0: i32) -> (i32, i32) {
    %c0_i32 = arith.constant 0 : i32
    %c0_i32_0 = arith.constant 0 : i32
    %c0_i32_1 = arith.constant 0 : i32
    return %c0_i32, %c0_i32_0 : i32, i32
  }
  func.func @transform_3(%arg0: i32) -> (i32, i32) {
    %c0_i32 = arith.constant 0 : i32
    %c0_i32_0 = arith.constant 0 : i32
    %c0_i32_1 = arith.constant 0 : i32
    return %c0_i32, %c0_i32_0 : i32, i32
  }
  func.func @transform_4(%arg0: i32) -> (i32, i32, i32) {
    %c0_i32 = arith.constant 0 : i32
    %c0_i32_0 = arith.constant 0 : i32
    %c0_i32_1 = arith.constant 0 : i32
    return %arg0, %c0_i32, %c0_i32_0 : i32, i32, i32
  }
}

</mosaic_0001>

<bundles_post_ra>
// kernel: tpu_custom_call.1
= control target key start
LH: loop header
LB: loop body
LE: loop exit
PB: predicated region body
PF: predicated region fallthrough
CT: control target
= control target key end

     0   :  { %9 = vsyncpa [#allocation3], 0  ;;  %s1256_s0 = inlined_call_operand.hbm [shape: f32[2,8,32], index: 0, kind: input, shape index: {}]   ;;  %s1257_s1 = inlined_call_operand.hbm [shape: f32[32,96], index: 1, kind: input, shape index: {}]   ;;  %s1258_s2 = inlined_call_operand.hbm [shape: f32[32,32], index: 2, kind: input, shape index: {}]   ;;  %s1259_s3 = inlined_call_operand.vmem [shape: f32[1,32], index: 3, kind: input, shape index: {}]   ;;  %s1260_s4 = inlined_call_operand.hbm [shape: f32[2,8,32], index: 4, kind: output, shape index: {}]  }
   0x1   :  { %10 = vsyncpa [#allocation6], 0 }
   0x2   :  { %11 = vsyncpa [#allocation4], 0  ;;  %s29_s17 = sshll.u32 %s1257_s1, 4  ;;  %s1021_s18 = smov [#allocation5]   ;;  %s30_s17 = int_to_ptr.hbm [resolvable:$true] %s29_s17 }
   0x3   :  { %s31_s19 = sshll.u32 %s1021_s18, 4  ;;  %s16_s22 = sshll.u32 %s1256_s0, 4  ;;  %s32_s19 = int_to_ptr.vmem [resolvable:$true] %s31_s19  ;;  %s17_s22 = int_to_ptr.hbm [resolvable:$true] %s16_s22 }
   0x4   :  { %s1022_s23 = smov 128   ;;  %s1023_s24 = smov 8  }
   0x5   :  { %37 = dma.hbm_to_vmem [thread:$0]  %s30_s17, 512, %s32_s19, [#allocation6], %s1022_s23, %s1022_s23, %s1023_s24  }
   0x6   :  { %s1024_s25 = smov [#allocation2]   ;;  %s42_s1 = sshll.u32 %s1258_s2, 4  ;;  %s43_s1 = int_to_ptr.hbm [resolvable:$true] %s42_s1 }
   0x7   :  { %s18_s26 = sshll.u32 %s1024_s25, 4  ;;  %s1025_s0 = smov [#allocation7]   ;;  %s19_s26 = int_to_ptr.vmem [resolvable:$true] %s18_s26 }
   0x8   :  { %24 = dma.hbm_to_vmem [thread:$0]  %s17_s22, 256, %s19_s26, [#allocation3], %s1022_s23, %s1022_s23, %s1023_s24  }
   0x9   :  { %s44_s29 = sshll.u32 %s1025_s0, 4  ;;  %s45_s29 = int_to_ptr.vmem [resolvable:$true] %s44_s29 }
   0xa   :  { %50 = dma.hbm_to_vmem [thread:$0]  %s43_s1, 512, %s45_s29, [#allocation6], %s1022_s23, %s1022_s23, %s1023_s24  }
   0xb   :  { %1015 = dma.done.wait [#allocation3], 256  }
   0xc   :  { %1016 = vsyncadd [#allocation3], 4294967040 }
   0xd   :  { %1017 = dma.done.wait [#allocation6], 1024  }
   0xe   :  { %1018 = vsyncadd [#allocation6], 4294966272  ;;  %v70_v0 = vld [vmem:[#allocation5 + $0x18] sm:$0xff]  ;;  %v69_v1 = vld [vmem:[#allocation5 + $0x10] sm:$0xff]  ;;  %vm71_vm0 = vcmask 261120   ;;  %s1026_s2 = smov 104   ;;  %v324_v26 = vlaneseq }
   0xf   :  { %90 = vmatpush.msra.mxu0 %v70_v0  ;;  %v68_v2 = vld [vmem:[#allocation5 + $0x8] sm:$0xff]  ;;  %v67_v3 = vld [vmem:[#allocation5] sm:$0xff]  ;;  %v65_v4 = vld [vmem:[#allocation2] sm:$0xff]  ;;  %s1027_s30 = smov 112   ;;  %s1028_s5 = smov 120   ;;  %vm117_vm1 = vcmask 64512  }
  0x10   :  { %v66_v5 = vld [vmem:[#allocation2 + $0x8] sm:$0xff]  ;;  %s1029_s6 = smov 96   ;;  %s1030_s7 = smov 64   ;;  %v325_v27 = vshrl.u32 %v324_v26, 7  ;;  %v327_v28 = vand.u32 127, %v324_v26 }
  0x11   :  { %91 = vmatpush.msra.mxu0 %v69_v1  ;;  %s1031_s8 = smov 24   ;;  %s1032_s9 = smov 16  }
  0x12   :  { %vm1123_vm2 = vcmp.le.s32.totalorder %v327_v28, %v325_v27  ;;  %s1033_s12 = smov [#allocation8]   ;;  %s816_s16 = sshll.u32 %s1260_s4, 4  ;;  %s817_s16 = int_to_ptr.hbm [resolvable:$true] %s816_s16 }
  0x13   :  { %92 = vmatpush.msra.mxu0 %v68_v2  ;;  %s814_s13 = sshll.u32 %s1033_s12, 4  ;;  %s815_s13 = int_to_ptr.vmem [resolvable:$true] %s814_s13 }
  0x15   :  { %93 = vmatpush.msra.mxu0 %v67_v3 }
  0x16   :  { %830 = vmatmul.msk.f32.vlgmr.msra.gmra.mxu0 %vm71_vm0, %v65_v4 }
  0x1e   :  { %831 = vmatmul.msk.f32.gmra.mxu0 %vm71_vm0, %v66_v5 }
  0x93   :  { %v95_v6 = vpop.f32.mrf.mxu0 }
  0x94   :  { %111 = vrot.lane.b32.xlu2 %v95_v6, %s1026_s2  ;;  %107 = vrot.lane.b32.xlu0 %v95_v6, %s1027_s30 }
  0x9b   :  { %v1079_v7 = vpop.f32.mrf.mxu0 }
  0x9c   :  { %103 = vrot.lane.b32.xlu0 %v95_v6, %s1028_s5  ;;  %109 = vrot.lane.b32.xlu2 %v1079_v7, %s1027_s30 }
  0x9d   :  { %105 = vrot.lane.b32.xlu1 %v1079_v7, %s1028_s5 }
  0xa4   :  { %142 = vrot.lane.b32.xlu0 %v1079_v7, %s1029_s6 }
  0xa5   :  { %113 = vrot.lane.b32.xlu1 %v1079_v7, %s1026_s2 }
  0xad   :  { %115 = vrot.lane.b32.xlu1 %v95_v6, %s1029_s6 }
  0xee   :  { %v1088_v9 = vpop.permute.xlu2 %111 }
  0xef   :  { %v881_v57 = vpack.i.bf16 %v1088_v9, %v1079_v7 }
  0xf6   :  { %v1093_v13 = vpop.permute.xlu2 %109 }
 0x106   :  { %v1085_v8 = vpop.permute.xlu0 %107 }
 0x107   :  { %220 = vrot.lane.b32.xlu2 %v1085_v8, %s1029_s6 }
 0x10e   :  { %v104_v10 = vpop.permute.xlu0 %103 }
 0x10f   :  { %v1090_v11 = vpop.permute.xlu1 %105  ;;  %168 = vrot.lane.b32.xlu0 %v104_v10, %s1029_s6  ;;  %v871_v15 = vpack.i.bf16 %v104_v10, %v95_v6 }
 0x110   :  { %194 = vrot.lane.b32.xlu1 %v1090_v11, %s1029_s6  ;;  %v876_v59 = vpack.i.bf16 %v1090_v11, %v1085_v8 }
 0x116   :  { %v143_v12 = vpop.permute.xlu0 %142 }
 0x117   :  { %v1095_v14 = vpop.permute.xlu1 %113  ;;  %272 = vrot.lane.b32.xlu0 %v1088_v9, %s1029_s6  ;;  %834 = vmatpush.xpose.msk.msra.mxu2 %vm117_vm1, %v143_v12 }
 0x118   :  { %246 = vrot.lane.b32.xlu1 %v1093_v13, %s1029_s6  ;;  %298 = vrot.lane.b32.xlu2 %v1095_v14, %s1029_s6 }
 0x11a   :  { %835 = vmatmul.msk.f32.vlgmr.msra.gmra.mxu2 %vm117_vm1, %v1079_v7 }
 0x11f   :  { %v116_v16 = vpop.permute.xlu1 %115 }
 0x120   :  { %872 = vrot.lane.b32.xlu2 %v871_v15, %s1030_s7  ;;  %832 = vmatpush.xpose.msk.msra.mxu1 %vm117_vm1, %v116_v16 }
 0x123   :  { %833 = vmatmul.msk.f32.vlgmr.msra.gmra.mxu1 %vm117_vm1, %v95_v6 }
 0x161   :  { %v221_v17 = vpop.permute.xlu2 %220 }
 0x162   :  { %840 = vmatpush.xpose.msk.msrb.mxu2 %vm117_vm1, %v221_v17 }
 0x165   :  { %841 = vmatmul.msk.f32.vlgmr.msrb.gmra.mxu2 %vm117_vm1, %v1085_v8 }
 0x172   :  { %v299_v18 = vpop.permute.xlu2 %298 }
 0x173   :  { %846 = vmatpush.xpose.msk.msra.mxu2 %vm117_vm1, %v299_v18 }
 0x176   :  { %847 = vmatmul.msk.f32.vlgmr.msra.gmra.mxu2 %vm117_vm1, %v1095_v14 }
 0x17a   :  { %v873_v21 = vpop.permute.xlu2 %872 }
 0x17b   :  { %v875_v22 = vunpack.i.h.bf16 %v873_v21  ;;  %v874_v25 = vunpack.i.l.bf16 %v873_v21 }
 0x181   :  { %v169_v19 = vpop.permute.xlu0 %168 }
 0x182   :  { %v195_v20 = vpop.permute.xlu1 %194  ;;  %836 = vmatpush.xpose.msk.msrb.mxu0 %vm117_vm1, %v169_v19 }
 0x183   :  { %838 = vmatpush.xpose.msk.msrb.mxu1 %vm117_vm1, %v195_v20 }
 0x185   :  { %837 = vmatmul.msk.f32.vlgmr.msrb.gmra.mxu0 %vm117_vm1, %v104_v10 }
 0x186   :  { %839 = vmatmul.msk.f32.vlgmr.msrb.gmra.mxu1 %vm117_vm1, %v1090_v11 }
 0x189   :  { %v273_v23 = vpop.permute.xlu0 %272 }
 0x18a   :  { %v247_v24 = vpop.permute.xlu1 %246  ;;  %844 = vmatpush.xpose.msk.msra.mxu1 %vm117_vm1, %v273_v23 }
 0x18b   :  { %842 = vmatpush.xpose.msk.msra.mxu3 %vm117_vm1, %v247_v24 }
 0x18e   :  { %484 = vmatpush.msrb.mxu1 %v875_v22  ;;  %843 = vmatmul.msk.f32.vlgmr.msra.gmra.mxu3 %vm117_vm1, %v1093_v13 }
 0x18f   :  { %432 = vmatpush.msrb.mxu3 %v874_v25  ;;  %845 = vmatmul.msk.f32.vlgmr.msra.gmra.mxu1 %vm117_vm1, %v1088_v9 }
 0x19d   :  { %v165_v30 = vpop.f32.mrf.mxu2 }
 0x19e   :  { %v332_v31 = vsel %vm1123_vm2, %v165_v30, -inf }
 0x19f   :  { %v342_v32 = vsel %vm117_vm1, %v332_v31, -inf }
 0x1a0   :  { %v139_v33 = vpop.f32.mrf.mxu1  ;;  %343 = vmax.xlane.f32.xlu0 %v342_v32 }
 0x1a1   :  { %v331_v34 = vsel %vm1123_vm2, %v139_v33, -inf }
 0x1a2   :  { %v339_v35 = vsel %vm117_vm1, %v331_v34, -inf }
 0x1a3   :  { %340 = vmax.xlane.f32.xlu2 %v339_v35 }
 0x1e8   :  { %v243_v36 = vpop.f32.mrf.mxu2 }
 0x1e9   :  { %v335_v37 = vsel %vm1123_vm2, %v243_v36, -inf }
 0x1ea   :  { %v351_v38 = vsel %vm117_vm1, %v335_v37, -inf }
 0x1eb   :  { %352 = vmax.xlane.f32.xlu1 %v351_v38 }
 0x1f9   :  { %v321_v45 = vpop.f32.mrf.mxu2 }
 0x1fa   :  { %v338_v46 = vsel %vm1123_vm2, %v321_v45, -inf }
 0x1fb   :  { %v360_v49 = vsel %vm117_vm1, %v338_v46, -inf }
 0x202   :  { %v191_v39 = vpop.f32.mrf.mxu0 }
 0x203   :  { %v333_v40 = vsel %vm1123_vm2, %v191_v39, -inf  ;;  %v217_v41 = vpop.f32.mrf.mxu1 }
 0x204   :  { %v334_v42 = vsel %vm1123_vm2, %v217_v41, -inf  ;;  %v345_v43 = vsel %vm117_vm1, %v333_v40, -inf }
 0x205   :  { %346 = vmax.xlane.f32.xlu0 %v345_v43  ;;  %v348_v44 = vsel %vm117_vm1, %v334_v42, -inf }
 0x206   :  { %349 = vmax.xlane.f32.xlu2 %v348_v44 }
 0x20c   :  { %v295_v47 = vpop.f32.mrf.mxu1 }
 0x20d   :  { %v337_v48 = vsel %vm1123_vm2, %v295_v47, -inf  ;;  %361 = vmax.xlane.f32.xlu0 %v360_v49 }
 0x20e   :  { %v357_v50 = vsel %vm117_vm1, %v337_v48, -inf }
 0x20f   :  { %358 = vmax.xlane.f32.xlu1 %v357_v50 }
 0x211   :  { %v269_v51 = vpop.f32.mrf.mxu3 }
 0x212   :  { %v336_v52 = vsel %vm1123_vm2, %v269_v51, -inf }
 0x213   :  { %v354_v53 = vsel %vm117_vm1, %v336_v52, -inf  ;;  %v344_v1 = vpop.xlane.xlu0 %343 }
 0x214   :  { %v364_v2 = vsub.f32 %v332_v31, %v344_v1 }
 0x215   :  { %355 = vmax.xlane.f32.xlu0 %v354_v53 }
 0x216   :  { %v341_v54 = vpop.xlane.xlu2 %340  ;;  %v373_v6 = vmul.f32 1.442695, %v364_v2 }
 0x217   :  { %v363_v55 = vsub.f32 %v331_v34, %v341_v54 }
 0x219   :  { %v371_v56 = vmul.f32 1.442695, %v363_v55 }
 0x21b   :  { %887 = vpow2.f32 %v371_v56 }
 0x21e   :  { %882 = vrot.lane.b32.xlu2 %v881_v57, %s1030_s7 }
 0x221   :  { %v1154_v58 = vpop.eup %887 }
 0x222   :  { %848 = vmatmul.msk.f32.vlgmr.msrb.gmra.mxu3 %vm117_vm1, %v1154_v58  ;;  %v387_v34 = vsel %vm117_vm1, %v1154_v58, 0.0 }
 0x226   :  { %541 = vrot.lane.b32.xlu2 %v1093_v13, %s1030_s7 }
 0x228   :  { %877 = vrot.lane.b32.xlu1 %v876_v59, %s1030_s7 }
 0x229   :  { %593 = vrot.lane.b32.xlu0 %v1095_v14, %s1030_s7 }
 0x25e   :  { %v353_v60 = vpop.xlane.xlu1 %352 }
 0x25f   :  { %v367_v61 = vsub.f32 %v335_v37, %v353_v60 }
 0x261   :  { %v379_v62 = vmul.f32 1.442695, %v367_v61 }
 0x263   :  { %889 = vpow2.f32 %v379_v62 }
 0x269   :  { %v1165_v63 = vpop.eup %889 }
 0x26a   :  { %v399_v0 = vsel %vm117_vm1, %v1165_v63, 0.0 }
 0x26b   :  { %400 = vadd.xlane.f32.xlu2 %v399_v0 }
 0x278   :  { %v347_v3 = vpop.xlane.xlu0 %346 }
 0x279   :  { %v365_v4 = vsub.f32 %v333_v40, %v347_v3  ;;  %v350_v5 = vpop.xlane.xlu2 %349 }
 0x27a   :  { %v366_v8 = vsub.f32 %v334_v42, %v350_v5 }
 0x27b   :  { %v375_v7 = vmul.f32 1.442695, %v365_v4 }
 0x27c   :  { %v377_v9 = vmul.f32 1.442695, %v366_v8 }
 0x27d   :  { %891 = vpow2.f32 %v375_v7 }
 0x27e   :  { %893 = vpow2.f32 %v373_v6 }
 0x27f   :  { %895 = vpow2.f32 %v377_v9 }
 0x280   :  { %v362_v10 = vpop.xlane.xlu0 %361 }
 0x281   :  { %v883_v11 = vpop.permute.xlu2 %882  ;;  %v370_v18 = vsub.f32 %v338_v46, %v362_v10 }
 0x282   :  { %v359_v12 = vpop.xlane.xlu1 %358  ;;  %v885_v13 = vunpack.i.h.bf16 %v883_v11  ;;  %v884_v14 = vunpack.i.l.bf16 %v883_v11 }
 0x283   :  { %v369_v15 = vsub.f32 %v337_v48, %v359_v12  ;;  %v892_v16 = vpop.eup %891  ;;  %v385_v21 = vmul.f32 1.442695, %v370_v18 }
 0x284   :  { %v894_v17 = vpop.eup %893  ;;  %458 = vmatpush.msra.mxu0 %v884_v14  ;;  %588 = vmatpush.msra.mxu1 %v885_v13  ;;  %v393_v20 = vsel %vm117_vm1, %v892_v16, 0.0 }
 0x285   :  { %v383_v19 = vmul.f32 1.442695, %v369_v15  ;;  %849 = vmatmul.msk.f32.vlgmr.msra.gmra.mxu0 %vm117_vm1, %v894_v17  ;;  %850 = vmatmul.msk.f32.vlgmr.msrb.gmra.mxu1 %vm117_vm1, %v892_v16  ;;  %v896_v25 = vpop.eup %895  ;;  %v390_v39 = vsel %vm117_vm1, %v894_v17, 0.0 }
 0x286   :  { %394 = vadd.xlane.f32.xlu1 %v393_v20  ;;  %v396_v28 = vsel %vm117_vm1, %v896_v25, 0.0 }
 0x287   :  { %897 = vpow2.f32 %v383_v19 }
 0x288   :  { %v356_v22 = vpop.xlane.xlu0 %355  ;;  %899 = vpow2.f32 %v385_v21 }
 0x289   :  { %v542_v23 = vpop.permute.xlu2 %541  ;;  %v368_v24 = vsub.f32 %v336_v52, %v356_v22 }
 0x28a   :  { %562 = vmatpush.msrb.mxu0 %v542_v23 }
 0x28b   :  { %v381_v26 = vmul.f32 1.442695, %v368_v24 }
 0x28d   :  { %v898_v27 = vpop.eup %897  ;;  %901 = vpow2.f32 %v381_v26 }
 0x28e   :  { %854 = vmatmul.msk.f32.vlgmr.msra.gmra.mxu1 %vm117_vm1, %v898_v27  ;;  %v405_v29 = vsel %vm117_vm1, %v898_v27, 0.0  ;;  %397 = vadd.xlane.f32.xlu1 %v396_v28  ;;  %v900_v30 = vpop.eup %899 }
 0x28f   :  { %406 = vadd.xlane.f32.xlu0 %v405_v29  ;;  %v408_v33 = vsel %vm117_vm1, %v900_v30, 0.0 }
 0x293   :  { %v902_v31 = vpop.eup %901 }
 0x294   :  { %853 = vmatmul.msk.f32.vlgmr.msrb.gmra.mxu0 %vm117_vm1, %v902_v31  ;;  %v402_v32 = vsel %vm117_vm1, %v902_v31, 0.0 }
 0x295   :  { %403 = vadd.xlane.f32.xlu2 %v402_v32 }
 0x296   :  { %409 = vadd.xlane.f32.xlu1 %v408_v33 }
 0x297   :  { %388 = vadd.xlane.f32.xlu0 %v387_v34 }
 0x29a   :  { %v878_v35 = vpop.permute.xlu1 %877 }
 0x29b   :  { %v880_v36 = vunpack.i.h.bf16 %v878_v35  ;;  %v879_v37 = vunpack.i.l.bf16 %v878_v35  ;;  %v594_v38 = vpop.permute.xlu0 %593 }
 0x29d   :  { %510 = vmatpush.msrb.mxu2 %v880_v36  ;;  %536 = vmatpush.msra.mxu3 %v879_v37 }
 0x29e   :  { %851 = vmatmul.msk.f32.vlgmr.msrb.gmra.mxu2 %vm117_vm1, %v896_v25  ;;  %852 = vmatmul.msk.f32.vlgmr.msra.gmra.mxu3 %vm117_vm1, %v1165_v63 }
 0x29f   :  { %614 = vmatpush.msra.mxu2 %v594_v38  ;;  %391 = vadd.xlane.f32.xlu2 %v390_v39 }
 0x2a5   :  { %v1211_v23 = vpop.f32.mrf.mxu3 }
 0x2a6   :  { %855 = vmatmul.msk.f32.vlgmr.msra.gmra.mxu2 %vm117_vm1, %v900_v30 }
 0x2de   :  { %v1185_v42 = vpop.xlane.xlu2 %400 }
 0x2df   :  { %v690_v31 = vand.u32 2147483648, %v1185_v42  ;;  %vm684_vm2 = vweird.f32 %v1185_v42  ;;  %v688_v32 = vand.u32 2147483647, %v1185_v42 }
 0x2e1   :  { %v691_v36 = vor.u32 1.1754944e-38, %v690_v31 }
 0x2f9   :  { %v395_v40 = vpop.xlane.xlu1 %394 }
 0x2fa   :  { %903 = vrcp.f32 %v395_v40  ;;  %v660_v47 = vand.u32 2147483648, %v395_v40  ;;  %v658_v49 = vand.u32 2147483647, %v395_v40  ;;  %vm654_vm4 = vweird.f32 %v395_v40 }
 0x2fc   :  { %v661_v53 = vor.u32 1.1754944e-38, %v660_v47  ;;  %vm659_vm6 = vcmp.eq.f32.partialorder %v658_v49, 8.507059e+37 }
 0x300   :  { %v904_v41 = vpop.eup %903 }
 0x301   :  { %v650_v43 = vmul.f32 %v904_v41, %v395_v40  ;;  %v1187_v45 = vpop.xlane.xlu1 %397  ;;  %vm655_vm3 = vweird.f32 %v904_v41 }
 0x302   :  { %v407_v44 = vpop.xlane.xlu0 %406  ;;  %v486_v52 = vpop.f32.mrf.mxu1  ;;  %vm656_vm5 = vmor %vm654_vm4, %vm655_vm3  ;;  %vm689_vm4 = vcmp.eq.f32.partialorder %v688_v32, 8.507059e+37 }
 0x303   :  { %905 = vrcp.f32 %v407_v44  ;;  %v651_v46 = vsub.f32 1.0, %v650_v43  ;;  %v720_v62 = vand.u32 2147483648, %v407_v44  ;;  %v718_v1 = vand.u32 2147483647, %v407_v44  ;;  %v1201_v8 = vpop.f32.mrf.mxu0 }
 0x304   :  { %907 = vrcp.f32 %v1185_v42  ;;  %vm714_vm8 = vweird.f32 %v407_v44  ;;  %v675_v43 = vand.u32 2147483648, %v1187_v45 }
 0x305   :  { %v652_v48 = vmul.f32 %v904_v41, %v651_v46  ;;  %v721_v5 = vor.u32 1.1754944e-38, %v720_v62  ;;  %vm719_vm10 = vcmp.eq.f32.partialorder %v718_v1, 8.507059e+37  ;;  %v673_v46 = vand.u32 2147483647, %v1187_v45 }
 0x307   :  { %v653_v50 = vadd.f32 %v904_v41, %v652_v48 }
 0x308   :  { %v404_v54 = vpop.xlane.xlu2 %403 }
 0x309   :  { %v906_v51 = vpop.eup %905  ;;  %v657_v56 = vsel %vm656_vm5, %v904_v41, %v653_v50  ;;  %909 = vrcp.f32 %v404_v54  ;;  %v1190_v57 = vpop.xlane.xlu1 %409  ;;  %v705_v15 = vand.u32 2147483648, %v404_v54  ;;  %v703_v17 = vand.u32 2147483647, %v404_v54 }
 0x30a   :  { %v710_v55 = vmul.f32 %v906_v51, %v407_v44  ;;  %v1192_v58 = vpop.eup %907  ;;  %v662_v59 = vsel %vm659_vm6, %v661_v53, %v657_v56  ;;  %911 = vrcp.f32 %v1187_v45  ;;  %vm715_vm7 = vweird.f32 %v906_v51 }
 0x30b   :  { %v663_v61 = vmul.f32 %v662_v59, %v486_v52  ;;  %913 = vrcp.f32 %v1190_v57  ;;  %v680_v63 = vmul.f32 %v1192_v58, %v1185_v42  ;;  %vm716_vm9 = vmor %vm714_vm8, %vm715_vm7  ;;  %v590_v12 = vpop.f32.mrf.mxu1  ;;  %vm699_vm12 = vweird.f32 %v404_v54  ;;  %v389_v59 = vpop.xlane.xlu0 %388 }
 0x30c   :  { %v711_v60 = vsub.f32 1.0, %v710_v55  ;;  %v706_v22 = vor.u32 1.1754944e-38, %v705_v15  ;;  %vm704_vm14 = vcmp.eq.f32.partialorder %v703_v17, 8.507059e+37  ;;  %vm685_vm15 = vweird.f32 %v1192_v58 }
 0x30d   :  { %741 = vrot.lane.b32.xlu1 %v663_v61, %s1023_s24  ;;  %v681_v7 = vsub.f32 1.0, %v680_v63  ;;  %vm686_vm3 = vmor %vm684_vm2, %vm685_vm15  ;;  %vm669_vm7 = vweird.f32 %v1187_v45  ;;  %v735_v44 = vand.u32 2147483648, %v1190_v57  ;;  %v733_v47 = vand.u32 2147483647, %v1190_v57 }
 0x30e   :  { %v712_v0 = vmul.f32 %v906_v51, %v711_v60  ;;  %v676_v50 = vor.u32 1.1754944e-38, %v675_v43  ;;  %915 = vrcp.f32 %v389_v59  ;;  %v771_v60 = vld [vmem:[#allocation7] sm:$0xff] }
 0x30f   :  { %v910_v2 = vpop.eup %909  ;;  %v682_v20 = vmul.f32 %v1192_v58, %v681_v7  ;;  %v628_v7 = vand.u32 2147483647, %v389_v59 }
 0x310   :  { %v713_v3 = vadd.f32 %v906_v51, %v712_v0  ;;  %v695_v4 = vmul.f32 %v910_v2, %v404_v54  ;;  %v1199_v6 = vpop.eup %911  ;;  %vm700_vm11 = vweird.f32 %v910_v2 }
 0x311   :  { %v1203_v10 = vpop.eup %913  ;;  %v665_v18 = vmul.f32 %v1199_v6, %v1187_v45  ;;  %vm701_vm13 = vmor %vm699_vm12, %vm700_vm11  ;;  %v564_v27 = vpop.f32.mrf.mxu0  ;;  %v683_v29 = vadd.f32 %v1192_v58, %v682_v20  ;;  %vm670_vm5 = vweird.f32 %v1199_v6  ;;  %vm674_vm11 = vcmp.eq.f32.partialorder %v673_v46, 8.507059e+37  ;;  %v774_v45 = vld [vmem:[#allocation7 + $0x18] sm:$0xff] }
 0x312   :  { %v717_v9 = vsel %vm716_vm9, %v906_v51, %v713_v3  ;;  %v696_v11 = vsub.f32 1.0, %v695_v4  ;;  %v725_v19 = vmul.f32 %v1203_v10, %v1190_v57  ;;  %vm730_vm6 = vweird.f32 %v1203_v10  ;;  %vm671_vm8 = vmor %vm669_vm7, %vm670_vm5  ;;  %797 = vmatpush.msrb.mxu3 %v774_v45  ;;  %v392_v62 = vpop.xlane.xlu2 %391 }
 0x313   :  { %v722_v13 = vsel %vm719_vm10, %v721_v5, %v717_v9  ;;  %v666_v25 = vsub.f32 1.0, %v665_v18  ;;  %v687_v34 = vsel %vm686_vm3, %v1192_v58, %v683_v29  ;;  %vm729_vm9 = vweird.f32 %v1190_v57  ;;  %v773_v57 = vld [vmem:[#allocation7 + $0x10] sm:$0xff]  ;;  %v772_v58 = vld [vmem:[#allocation7 + $0x8] sm:$0xff] }
 0x314   :  { %v723_v14 = vmul.f32 %v722_v13, %v590_v12  ;;  %v697_v16 = vmul.f32 %v910_v2, %v696_v11  ;;  %v726_v26 = vsub.f32 1.0, %v725_v19  ;;  %v692_v39 = vsel %vm689_vm4, %v691_v36, %v687_v34  ;;  %vm731_vm10 = vmor %vm729_vm9, %vm730_vm6  ;;  %798 = vmatpush.msrb.mxu3 %v773_v57  ;;  %v916_v61 = vpop.eup %915 }
 0x315   :  { %v667_v33 = vmul.f32 %v1199_v6, %v666_v25  ;;  %v736_v51 = vor.u32 1.1754944e-38, %v735_v44  ;;  %vm734_vm12 = vcmp.eq.f32.partialorder %v733_v47, 8.507059e+37  ;;  %v620_v63 = vmul.f32 %v916_v61, %v389_v59 }
 0x316   :  { %757 = vrot.lane.b32.xlu2 %v723_v14, %s1031_s8  ;;  %v698_v21 = vadd.f32 %v910_v2, %v697_v16  ;;  %v727_v35 = vmul.f32 %v1203_v10, %v726_v26  ;;  %799 = vmatpush.msrb.mxu3 %v772_v58  ;;  %917 = vrcp.f32 %v392_v62  ;;  %v630_v5 = vand.u32 2147483648, %v389_v59 }
 0x317   :  { %v668_v40 = vadd.f32 %v1199_v6, %v667_v33  ;;  %v621_v0 = vsub.f32 1.0, %v620_v63  ;;  %vm629_vm2 = vcmp.eq.f32.partialorder %v628_v7, 8.507059e+37  ;;  %v645_v15 = vand.u32 2147483648, %v392_v62  ;;  %v886_v33 = vld [vmem:[%s1259_s3] ss:$0 sm:$0xff] }
 0x318   :  { %v702_v24 = vsel %vm701_vm13, %v910_v2, %v698_v21  ;;  %v728_v42 = vadd.f32 %v1203_v10, %v727_v35  ;;  %800 = vmatpush.msrb.mxu3 %v771_v60  ;;  %vm625_vm13 = vweird.f32 %v916_v61  ;;  %vm765_vm4 = vcmask 130048  }
 0x319   :  { %v707_v28 = vsel %vm704_vm14, %v706_v22, %v702_v24  ;;  %v672_v48 = vsel %vm671_vm8, %v1199_v6, %v668_v40  ;;  %v622_v2 = vmul.f32 %v916_v61, %v621_v0  ;;  %vm624_vm14 = vweird.f32 %v389_v59 }
 0x31a   :  { %v708_v30 = vmul.f32 %v707_v28, %v564_v27  ;;  %v732_v49 = vsel %vm731_vm10, %v1203_v10, %v728_v42  ;;  %v677_v52 = vsel %vm674_vm11, %v676_v50, %v672_v48  ;;  %vm626_vm15 = vmor %vm624_vm14, %vm625_vm13  ;;  %v631_v10 = vor.u32 1.1754944e-38, %v630_v5 }
 0x31b   :  { %v737_v54 = vsel %vm734_vm12, %v736_v51, %v732_v49  ;;  %v623_v4 = vadd.f32 %v916_v61, %v622_v2  ;;  %vm639_vm5 = vweird.f32 %v392_v62  ;;  %v643_v17 = vand.u32 2147483647, %v392_v62 }
 0x31c   :  { %751 = vrot.lane.b32.xlu1 %v708_v30, %s1032_s9  ;;  %v918_v1 = vpop.eup %917  ;;  %vm768_vm6 = vcmask 195584   ;;  %v646_v24 = vor.u32 1.1754944e-38, %v645_v15 }
 0x31d   :  { %v635_v3 = vmul.f32 %v918_v1, %v392_v62  ;;  %v627_v9 = vsel %vm626_vm15, %v916_v61, %v623_v4  ;;  %vm640_vm3 = vweird.f32 %v918_v1  ;;  %vm644_vm8 = vcmp.eq.f32.partialorder %v643_v17, 8.507059e+37 }
 0x31e   :  { %v632_v12 = vsel %vm629_vm2, %v631_v10, %v627_v9  ;;  %vm641_vm7 = vmor %vm639_vm5, %vm640_vm3 }
 0x31f   :  { %v636_v6 = vsub.f32 1.0, %v635_v3  ;;  %v633_v16 = vmul.f32 %v632_v12, %v1211_v23 }
 0x321   :  { %v512_v37 = vpop.f32.mrf.mxu2  ;;  %v538_v38 = vpop.f32.mrf.mxu3  ;;  %v637_v11 = vmul.f32 %v918_v1, %v636_v6 }
 0x322   :  { %v693_v41 = vmul.f32 %v692_v39, %v538_v38  ;;  %v678_v55 = vmul.f32 %v677_v52, %v512_v37 }
 0x323   :  { %v638_v13 = vadd.f32 %v918_v1, %v637_v11 }
 0x324   :  { %749 = vrot.lane.b32.xlu0 %v693_v41, %s1032_s9 }
 0x325   :  { %v642_v22 = vsel %vm641_vm7, %v918_v1, %v638_v13 }
 0x326   :  { %v647_v26 = vsel %vm644_vm8, %v646_v24, %v642_v22 }
 0x327   :  { %v648_v23 = vmul.f32 %v647_v26, %v1201_v8 }
 0x329   :  { %v616_v53 = vpop.f32.mrf.mxu2 }
 0x32a   :  { %v738_v56 = vmul.f32 %v737_v54, %v616_v53 }
 0x32c   :  { %759 = vrot.lane.b32.xlu2 %v738_v56, %s1031_s8  ;;  %743 = vrot.lane.b32.xlu0 %v678_v55, %s1023_s24 }
 0x370   :  { %v758_v20 = vpop.permute.xlu2 %757 }
 0x37f   :  { %v742_v14 = vpop.permute.xlu1 %741 }
 0x380   :  { %v763_v18 = vsel %vm117_vm1, %v633_v16, %v742_v14 }
 0x386   :  { %v760_v30 = vpop.permute.xlu2 %759 }
 0x38e   :  { %v752_v28 = vpop.permute.xlu1 %751 }
 0x396   :  { %v750_v19 = vpop.permute.xlu0 %749 }
 0x397   :  { %v766_v21 = vsel %vm765_vm4, %v763_v18, %v750_v19 }
 0x398   :  { %v769_v25 = vsel %vm768_vm6, %v766_v21, %v758_v20 }
 0x399   :  { %856 = vmatmul.msk.f32.vlgmr.msrb.gmra.mxu3 %vm71_vm0, %v769_v25 }
 0x39e   :  { %v744_v27 = vpop.permute.xlu0 %743 }
 0x39f   :  { %v764_v29 = vsel %vm117_vm1, %v648_v23, %v744_v27 }
 0x3a0   :  { %v767_v31 = vsel %vm765_vm4, %v764_v29, %v752_v28 }
 0x3a1   :  { %v770_v32 = vsel %vm768_vm6, %v767_v31, %v760_v30 }
 0x3a2   :  { %857 = vmatmul.msk.f32.gmra.mxu3 %vm71_vm0, %v770_v32 }
 0x41c   :  { %v802_v34 = vpop.f32.mrf.mxu3 }
 0x41d   :  { %v803_v35 = vadd.f32 %v886_v33, %v802_v34 }
 0x41f   :  { %808 = vst.msk [vmem:[#allocation8] sm:$0xff] %vm71_vm0, %v803_v35 }
 0x425   :  { %v805_v8 = vpop.f32.mrf.mxu3 }
 0x426   :  { %v806_v36 = vadd.f32 %v886_v33, %v805_v8 }
 0x428   :  { %809 = vst.msk [vmem:[#allocation8 + $0x8] sm:$0xff] %vm71_vm0, %v806_v36 }
 0x429   :  { %822 = dma.vmem_to_hbm [thread:$0]  %s815_s13, 256, %s817_s16, [#allocation4], %s1022_s23, %s1022_s23, %s1023_s24  }
 0x42a   :  { %1019 = dma.done.wait [#allocation4], 256  }
 0x42b   :  { %1020 = vsyncadd [#allocation4], 4294967040 }
 0x42c   :  { %827 = vsyncpa [#allocation3], 1 }
 0x42d   :  { %828 = vsyncpa [#allocation6], 1 }
 0x42e   :  { %829 = vsyncpa [#allocation4], 1 }

</bundles_post_ra>
